<compile_context>
chip_gen: v7x
topology: tpu7x:2x2x1
jax: 0.10.0
libtpu: 0.0.40
codegen_flags: <defaults>
</compile_context>

<pallas_src>
import math

import jax
import jax.numpy as jnp
from jax.experimental import pallas as pl
from jax.experimental.pallas import tpu as pltpu


def _fc_tanh_kernel(x_ref, w_ref, b_ref, o_ref):
    # x_ref: (tile_b, D), w_ref: (D, OUT) resident, b_ref: (1, OUT) resident,
    # o_ref: (tile_b, OUT).  Plain (M,K)@(K,N) -> MXU, f32 accumulate.
    acc = jnp.dot(x_ref[...], w_ref[...], preferred_element_type=jnp.float32)
    o_ref[...] = jnp.tanh(acc + b_ref[...]).astype(o_ref.dtype)


def prepare_params(weight, bias):
    """One-time parameter prep (do at load time, NOT per forward call).

    weight (OUT, D) -> (D, OUT) so the kernel contracts LHS dim 1 with RHS
    dim 0 (no in-kernel transpose); bias (OUT,) -> (1, OUT) for broadcast."""
    return jnp.asarray(weight).T, jnp.asarray(bias).reshape(1, -1)


def _round_up(n, m):
    return ((n + m - 1) // m) * m


def _pick_tile_b(B, max_tile_b):
    if B <= 8:
        return B  # single full-array block (legal: equals the full batch dim)
    # Multiple of 8 (sublane rule) and >= 2 grid steps so the "parallel" batch
    # axis can shard across both TensorCores on v7x.
    tile = min(_round_up(max_tile_b, 8), _round_up(pl.cdiv(B, 2), 8))
    return max(tile, 8)


def rejection_layer_forward(x_nchw, w_t, bias2d, *, max_tile_b=1024):
    """Flatten -> Linear -> Tanh.

    x_nchw: (B, ...) float32; w_t: (D, OUT) pre-transposed weight (see
    prepare_params); bias2d: (1, OUT)."""
    B = x_nchw.shape[0]
    D = math.prod(x_nchw.shape[1:])
    OUT = w_t.shape[1]

    x2d = x_nchw.reshape(B, D)  # torch.nn.Flatten (row-major, metadata-only)

    tile_b = _pick_tile_b(B, max_tile_b)
    grid_b = pl.cdiv(B, tile_b)

    return pl.pallas_call(
        _fc_tanh_kernel,
        out_shape=jax.ShapeDtypeStruct((B, OUT), x2d.dtype),
        grid_spec=pltpu.PrefetchScalarGridSpec(
            num_scalar_prefetch=0,
            grid=(grid_b,),
            in_specs=[
                pl.BlockSpec((tile_b, D), lambda i: (i, 0)),  # x tile (pipelined)
                pl.BlockSpec((D, OUT), lambda i: (0, 0)),     # weight (resident)
                pl.BlockSpec((1, OUT), lambda i: (0, 0)),     # bias (resident)
            ],
            out_specs=pl.BlockSpec((tile_b, OUT), lambda i: (i, 0)),
        ),
        compiler_params=pltpu.CompilerParams(
            dimension_semantics=("parallel",)),
    )(x2d, w_t, bias2d)


if __name__ == "__main__":
    key = jax.random.PRNGKey(0)
    k_x, k_w, k_b, k_x2 = jax.random.split(key, 4)

    # Small shapes consistent with the module: flatten(B,C,H,W) -> dim = C*H*W
    B, C, H, W = 2, 4, 16, 16
    DIM = C * H * W  # 1024
    OUT = 10

    x = jax.random.normal(k_x, (B, C, H, W), dtype=jnp.float32)

    # Deterministic parameter init (PyTorch Linear-style uniform bounds)
    bound = 1.0 / (DIM ** 0.5)
    weight = jax.random.uniform(k_w, (OUT, DIM), jnp.float32, -bound, bound)
    bias = jax.random.uniform(k_b, (OUT,), jnp.float32, -bound, bound)

    # One-time parameter prep (hoisted out of the forward path).
    w_t, b2 = prepare_params(weight, bias)

    y = rejection_layer_forward(x, w_t, b2)
    jax.block_until_ready(y)

    ref = jnp.tanh(x.reshape(B, DIM) @ weight.T + bias)
    assert y.shape == (B, OUT)
    assert jnp.allclose(y, ref, atol=1e-5, rtol=1e-5)

    # Also exercise the tiled path (>= 2 grid steps, partial last block).
    B2 = 20
    x2 = jax.random.normal(k_x2, (B2, C, H, W), dtype=jnp.float32)
    y2 = rejection_layer_forward(x2, w_t, b2)
    jax.block_until_ready(y2)
    ref2 = jnp.tanh(x2.reshape(B2, DIM) @ weight.T + bias)
    assert y2.shape == (B2, OUT)
    assert jnp.allclose(y2, ref2, atol=1e-5, rtol=1e-5)

    print("KERNEL_OK")
</pallas_src>

<mosaic_0001>
module attributes {stable_mosaic.version = 11 : i64} {
  func.func @_fc_tanh_kernel(%arg0: i32, %arg1: memref<2x1024xf32, #tpu.memory_space<vmem>>, %arg2: memref<1024x10xf32, #tpu.memory_space<vmem>>, %arg3: memref<1x10xf32, #tpu.memory_space<vmem>>, %arg4: memref<2x10xf32, #tpu.memory_space<vmem>>) attributes {dimension_semantics = [#tpu.dimension_semantics<parallel>], iteration_bounds = array<i64: 1>, scalar_prefetch = 0 : i64, scratch_operands = 0 : i64, tpu.core_type = #tpu.core_type<tc>, window_params = [{transform_indices = @transform_0, window_bounds = array<i64: 2, 1024>}, {pipeline_mode = #tpu.pipeline_mode<synchronous>, transform_indices = @transform_1, window_bounds = array<i64: 1024, 10>}, {pipeline_mode = #tpu.pipeline_mode<synchronous>, transform_indices = @transform_2, window_bounds = array<i64: 1, 10>}, {transform_indices = @transform_3, window_bounds = array<i64: 2, 10>}]} {
    %c0 = arith.constant 0 : index
    %c0_0 = arith.constant 0 : index
    %0 = vector.load %arg1[%c0, %c0_0] : memref<2x1024xf32, #tpu.memory_space<vmem>>, vector<2x1024xf32>
    %c0_1 = arith.constant 0 : index
    %c0_2 = arith.constant 0 : index
    %1 = vector.load %arg2[%c0_1, %c0_2] : memref<1024x10xf32, #tpu.memory_space<vmem>>, vector<1024x10xf32>
    %cst = arith.constant dense<0.000000e+00> : vector<2x10xf32>
    %2 = tpu.matmul %0, %1, %cst {dimension_numbers = #tpu.dot_dimension_numbers<[1], [0], [0], [1], [0, 0, 1, 1], [], []>} : vector<2x1024xf32>, vector<1024x10xf32>, vector<2x10xf32> -> vector<2x10xf32>
    %c0_3 = arith.constant 0 : index
    %c0_4 = arith.constant 0 : index
    %3 = vector.load %arg3[%c0_3, %c0_4] : memref<1x10xf32, #tpu.memory_space<vmem>>, vector<1x10xf32>
    %4 = vector.broadcast %3 : vector<1x10xf32> to vector<2x10xf32>
    %5 = arith.addf %2, %4 : vector<2x10xf32>
    %6 = math.tanh %5 : vector<2x10xf32>
    %c0_5 = arith.constant 0 : index
    %c0_6 = arith.constant 0 : index
    %7 = vector.load %arg4[%c0_5, %c0_6] : memref<2x10xf32, #tpu.memory_space<vmem>>, vector<2x10xf32>
    tpu.vector_store %arg4[%c0_5, %c0_6], %6 {strides = array<i32>} : memref<2x10xf32, #tpu.memory_space<vmem>>, vector<2x10xf32>,
    return
  }
  func.func @transform_0(%arg0: i32) -> (i32, i32) {
    %c0_i32 = arith.constant 0 : i32
    %c0_i32_0 = arith.constant 0 : i32
    return %arg0, %c0_i32 : i32, i32
  }
  func.func @transform_1(%arg0: i32) -> (i32, i32) {
    %c0_i32 = arith.constant 0 : i32
    %c0_i32_0 = arith.constant 0 : i32
    %c0_i32_1 = arith.constant 0 : i32
    return %c0_i32, %c0_i32_0 : i32, i32
  }
  func.func @transform_2(%arg0: i32) -> (i32, i32) {
    %c0_i32 = arith.constant 0 : i32
    %c0_i32_0 = arith.constant 0 : i32
    %c0_i32_1 = arith.constant 0 : i32
    return %c0_i32, %c0_i32_0 : i32, i32
  }
  func.func @transform_3(%arg0: i32) -> (i32, i32) {
    %c0_i32 = arith.constant 0 : i32
    %c0_i32_0 = arith.constant 0 : i32
    return %arg0, %c0_i32 : i32, i32
  }
}

</mosaic_0001>

<bundles_post_ra>
// kernel: tpu_custom_call.1
= control target key start
LH: loop header
LB: loop body
LE: loop exit
PB: predicated region body
PF: predicated region fallthrough
CT: control target
= control target key end

     0   :  { %v792_v47 = vmov 1983009808   ;;  %v158_v49 = vlaneseq  ;;  %s1230_s0 = inlined_call_operand.vmem [shape: f32[2,1024], index: 0, kind: input, shape index: {}]   ;;  %s1231_s1 = inlined_call_operand.vmem [shape: f32[1024,10], index: 1, kind: input, shape index: {}]   ;;  %s1232_s2 = inlined_call_operand.vmem [shape: f32[1,10], index: 2, kind: input, shape index: {}]   ;;  %s1233_s3 = inlined_call_operand.hbm [shape: f32[2,10], index: 3, kind: output, shape index: {}]  }
   0x1   :  { %v33_v0 = vld [vmem:[%s1231_s1 + $0x80] sm:$0xff]  ;;  %v34_v1 = vld [vmem:[%s1231_s1 + $0x88] sm:$0xff]  ;;  %v35_v11 = vld [vmem:[%s1231_s1 + $0x90] sm:$0xff]  ;;  %v156_v48 = vunpack.c.l.s4 %v792_v47 }
   0x2   :  { %v17_v2 = vld [vmem:[%s1231_s1] sm:$0xff]  ;;  %v634_v3 = vpack.c.bf16 %v34_v1, %v33_v0  ;;  %v18_v4 = vld [vmem:[%s1231_s1 + $0x8] sm:$0xff]  ;;  %v36_v13 = vld [vmem:[%s1231_s1 + $0x98] sm:$0xff]  ;;  %v159_v0 = vshrl.u32 %v158_v49, 7 }
   0x3   :  { %v65_v5 = vld [vmem:[%s1231_s1 + $0x180] sm:$0xff]  ;;  %v66_v6 = vld [vmem:[%s1231_s1 + $0x188] sm:$0xff]  ;;  %v636_v7 = vpack.c.bf16 %v18_v4, %v17_v2  ;;  %v19_v14 = vld [vmem:[%s1231_s1 + $0x10] sm:$0xff]  ;;  %v638_v16 = vpack.c.bf16 %v36_v13, %v35_v11  ;;  %v157_v63 = vunpack.c.0.s8 %v156_v48 }
   0x4   :  { %v666_v8 = vpack.c.bf16 %v66_v6, %v65_v5  ;;  %v49_v9 = vld [vmem:[%s1231_s1 + $0x100] sm:$0xff]  ;;  %v50_v10 = vld [vmem:[%s1231_s1 + $0x108] sm:$0xff]  ;;  %635 = vmatprep.subr.bf16.mxu0 %v634_v3  ;;  %v20_v15 = vld [vmem:[%s1231_s1 + $0x18] sm:$0xff] }
   0x5   :  { %v668_v12 = vpack.c.bf16 %v50_v10, %v49_v9  ;;  %637 = vmatpush3.bf16.msra.mxu0 %v636_v7  ;;  %v640_v17 = vpack.c.bf16 %v20_v15, %v19_v14  ;;  %v67_v18 = vld [vmem:[%s1231_s1 + $0x190] sm:$0xff]  ;;  %v68_v19 = vld [vmem:[%s1231_s1 + $0x198] sm:$0xff]  ;;  %v37_v23 = vld [vmem:[%s1231_s1 + $0xa0] sm:$0xff]  ;;  %v964_v13 = vsub.s32 %v157_v63, %v159_v0 }
   0x6   :  { %667 = vmatprep.subr.bf16.mxu1 %v666_v8  ;;  %v51_v20 = vld [vmem:[%s1231_s1 + $0x110] sm:$0xff]  ;;  %v670_v21 = vpack.c.bf16 %v68_v19, %v67_v18  ;;  %v52_v22 = vld [vmem:[%s1231_s1 + $0x118] sm:$0xff]  ;;  %v38_v24 = vld [vmem:[%s1231_s1 + $0xa8] sm:$0xff]  ;;  %639 = vmatprep.subr.bf16.mxu0 %v638_v16 }
   0x7   :  { %669 = vmatpush3.bf16.msra.mxu1 %v668_v12  ;;  %v672_v25 = vpack.c.bf16 %v52_v22, %v51_v20  ;;  %v642_v26 = vpack.c.bf16 %v38_v24, %v37_v23  ;;  %v21_v27 = vld [vmem:[%s1231_s1 + $0x20] sm:$0xff]  ;;  %v22_v28 = vld [vmem:[%s1231_s1 + $0x28] sm:$0xff]  ;;  %v39_v35 = vld [vmem:[%s1231_s1 + $0xb0] sm:$0xff] }
   0x8   :  { %v69_v29 = vld [vmem:[%s1231_s1 + $0x1a0] sm:$0xff]  ;;  %671 = vmatprep.subr.bf16.mxu1 %v670_v21  ;;  %v70_v30 = vld [vmem:[%s1231_s1 + $0x1a8] sm:$0xff]  ;;  %v644_v33 = vpack.c.bf16 %v22_v28, %v21_v27  ;;  %v40_v36 = vld [vmem:[%s1231_s1 + $0xb8] sm:$0xff] }
   0x9   :  { %v53_v31 = vld [vmem:[%s1231_s1 + $0x120] sm:$0xff]  ;;  %v54_v32 = vld [vmem:[%s1231_s1 + $0x128] sm:$0xff]  ;;  %641 = vmatpush3.bf16.msra.mxu0 %v640_v17  ;;  %v674_v34 = vpack.c.bf16 %v70_v30, %v69_v29  ;;  %v23_v37 = vld [vmem:[%s1231_s1 + $0x30] sm:$0xff]  ;;  %v646_v39 = vpack.c.bf16 %v40_v36, %v39_v35 }
   0xa   :  { %643 = vmatprep.subr.bf16.mxu0 %v642_v26  ;;  %v676_v38 = vpack.c.bf16 %v54_v32, %v53_v31  ;;  %v24_v40 = vld [vmem:[%s1231_s1 + $0x38] sm:$0xff]  ;;  %v71_v41 = vld [vmem:[%s1231_s1 + $0x1b0] sm:$0xff]  ;;  %v41_v46 = vld [vmem:[%s1231_s1 + $0xc0] sm:$0xff] }
   0xb   :  { %673 = vmatpush3.bf16.msra.mxu1 %v672_v25  ;;  %v72_v42 = vld [vmem:[%s1231_s1 + $0x1b8] sm:$0xff]  ;;  %v55_v44 = vld [vmem:[%s1231_s1 + $0x130] sm:$0xff]  ;;  %v42_v50 = vld [vmem:[%s1231_s1 + $0xc8] sm:$0xff]  ;;  %v648_v51 = vpack.c.bf16 %v24_v40, %v23_v37 }
   0xc   :  { %675 = vmatprep.subr.bf16.mxu1 %v674_v34  ;;  %v678_v43 = vpack.c.bf16 %v72_v42, %v71_v41  ;;  %v56_v45 = vld [vmem:[%s1231_s1 + $0x138] sm:$0xff]  ;;  %v73_v52 = vld [vmem:[%s1231_s1 + $0x1c0] sm:$0xff]  ;;  %v74_v53 = vld [vmem:[%s1231_s1 + $0x1c8] sm:$0xff]  ;;  %v650_v55 = vpack.c.bf16 %v42_v50, %v41_v46 }
   0xd   :  { %645 = vmatpush3.bf16.msra.mxu0 %v644_v33  ;;  %v680_v54 = vpack.c.bf16 %v56_v45, %v55_v44  ;;  %v25_v56 = vld [vmem:[%s1231_s1 + $0x40] sm:$0xff]  ;;  %v26_v57 = vld [vmem:[%s1231_s1 + $0x48] sm:$0xff]  ;;  %v682_v59 = vpack.c.bf16 %v74_v53, %v73_v52  ;;  %v43_v61 = vld [vmem:[%s1231_s1 + $0xd0] sm:$0xff] }
   0xe   :  { %647 = vmatprep.subr.bf16.mxu0 %v646_v39  ;;  %v57_v58 = vld [vmem:[%s1231_s1 + $0x140] sm:$0xff]  ;;  %v58_v60 = vld [vmem:[%s1231_s1 + $0x148] sm:$0xff]  ;;  %v44_v62 = vld [vmem:[%s1231_s1 + $0xd8] sm:$0xff]  ;;  %v652_v3 = vpack.c.bf16 %v26_v57, %v25_v56 }
   0xf   :  { %677 = vmatpush3.bf16.msra.mxu1 %v676_v38  ;;  %v75_v1 = vld [vmem:[%s1231_s1 + $0x1d0] sm:$0xff]  ;;  %v76_v2 = vld [vmem:[%s1231_s1 + $0x1d8] sm:$0xff]  ;;  %v684_v4 = vpack.c.bf16 %v58_v60, %v57_v58  ;;  %v654_v5 = vpack.c.bf16 %v44_v62, %v43_v61  ;;  %v45_v11 = vld [vmem:[%s1231_s1 + $0xe0] sm:$0xff] }
  0x10   :  { %679 = vmatprep.subr.bf16.mxu1 %v678_v43  ;;  %v27_v6 = vld [vmem:[%s1231_s1 + $0x50] sm:$0xff]  ;;  %v28_v7 = vld [vmem:[%s1231_s1 + $0x58] sm:$0xff]  ;;  %v686_v9 = vpack.c.bf16 %v76_v2, %v75_v1  ;;  %v46_v12 = vld [vmem:[%s1231_s1 + $0xe8] sm:$0xff] }
  0x11   :  { %649 = vmatpush3.bf16.msra.mxu0 %v648_v51  ;;  %v59_v8 = vld [vmem:[%s1231_s1 + $0x150] sm:$0xff]  ;;  %v60_v10 = vld [vmem:[%s1231_s1 + $0x158] sm:$0xff]  ;;  %v77_v14 = vld [vmem:[%s1231_s1 + $0x1e0] sm:$0xff]  ;;  %v656_v16 = vpack.c.bf16 %v28_v7, %v27_v6  ;;  %v658_v19 = vpack.c.bf16 %v46_v12, %v45_v11 }
  0x12   :  { %651 = vmatprep.subr.bf16.mxu0 %v650_v55  ;;  %v78_v15 = vld [vmem:[%s1231_s1 + $0x1e8] sm:$0xff]  ;;  %v29_v17 = vld [vmem:[%s1231_s1 + $0x60] sm:$0xff]  ;;  %v688_v18 = vpack.c.bf16 %v60_v10, %v59_v8  ;;  %v47_v25 = vld [vmem:[%s1231_s1 + $0xf0] sm:$0xff] }
  0x13   :  { %681 = vmatpush3.bf16.msra.mxu1 %v680_v54  ;;  %v30_v20 = vld [vmem:[%s1231_s1 + $0x68] sm:$0xff]  ;;  %v61_v21 = vld [vmem:[%s1231_s1 + $0x160] sm:$0xff]  ;;  %v690_v23 = vpack.c.bf16 %v78_v15, %v77_v14  ;;  %v48_v26 = vld [vmem:[%s1231_s1 + $0xf8] sm:$0xff] }
  0x14   :  { %683 = vmatprep.subr.bf16.mxu1 %v682_v59  ;;  %v15_v22 = vld [vmem:[%s1230_s0] sm:$0xff]  ;;  %v62_v24 = vld [vmem:[%s1231_s1 + $0x168] sm:$0xff]  ;;  %v79_v29 = vld [vmem:[%s1231_s1 + $0x1f0] sm:$0xff]  ;;  %v660_v31 = vpack.c.bf16 %v30_v20, %v29_v17  ;;  %v662_v35 = vpack.c.bf16 %v48_v26, %v47_v25 }
  0x15   :  { %653 = vmatpush3.bf16.msra.mxu0 %v652_v3  ;;  %v161_v27 = vrot.slane %v15_v22, %v964_v13  ;;  %v154_v28 = vcombine.high %v15_v22, %v15_v22  ;;  %v80_v30 = vld [vmem:[%s1231_s1 + $0x1f8] sm:$0xff]  ;;  %v692_v34 = vpack.c.bf16 %v62_v24, %v61_v21  ;;  %v31_v36 = vld [vmem:[%s1231_s1 + $0x70] sm:$0xff]  ;;  %v97_v41 = vld [vmem:[%s1231_s1 + $0x280] sm:$0xff] }
  0x16   :  { %655 = vmatprep.subr.bf16.mxu0 %v654_v5  ;;  %v32_v37 = vld [vmem:[%s1231_s1 + $0x78] sm:$0xff]  ;;  %v63_v38 = vld [vmem:[%s1231_s1 + $0x170] sm:$0xff]  ;;  %v694_v39 = vpack.c.bf16 %v80_v30, %v79_v29  ;;  %v98_v42 = vld [vmem:[%s1231_s1 + $0x288] sm:$0xff] }
  0x17   :  { %685 = vmatpush3.bf16.msra.mxu1 %v684_v4  ;;  %v169_v32 = vcombine.high %v161_v27, %v161_v27  ;;  %v168_v33 = vrot.slane %v154_v28, %v964_v13  ;;  %v64_v40 = vld [vmem:[%s1231_s1 + $0x178] sm:$0xff]  ;;  %v129_v44 = vld [vmem:[%s1231_s1 + $0x380] sm:$0xff]  ;;  %v130_v45 = vld [vmem:[%s1231_s1 + $0x388] sm:$0xff]  ;;  %v664_v46 = vpack.c.bf16 %v32_v37, %v31_v36  ;;  %v698_v48 = vpack.c.bf16 %v98_v42, %v97_v41 }
  0x18   :  { %687 = vmatprep.subr.bf16.mxu1 %v686_v9  ;;  %v696_v47 = vpack.c.bf16 %v64_v40, %v63_v38  ;;  %v81_v49 = vld [vmem:[%s1231_s1 + $0x200] sm:$0xff]  ;;  %v82_v50 = vld [vmem:[%s1231_s1 + $0x208] sm:$0xff]  ;;  %v730_v52 = vpack.c.bf16 %v130_v45, %v129_v44  ;;  %v99_v54 = vld [vmem:[%s1231_s1 + $0x290] sm:$0xff] }
  0x19   :  { %657 = vmatpush3.bf16.msra.mxu0 %v656_v16  ;;  %260 = vmatprep.mubr.f32.mxu0 %v169_v32  ;;  %v170_v43 = vcombine.high %v168_v33, %v168_v33  ;;  %v113_v51 = vld [vmem:[%s1231_s1 + $0x300] sm:$0xff]  ;;  %v114_v53 = vld [vmem:[%s1231_s1 + $0x308] sm:$0xff]  ;;  %v100_v55 = vld [vmem:[%s1231_s1 + $0x298] sm:$0xff]  ;;  %v700_v58 = vpack.c.bf16 %v82_v50, %v81_v49 }
  0x1a   :  { %659 = vmatprep.subr.bf16.mxu0 %v658_v19  ;;  %v131_v56 = vld [vmem:[%s1231_s1 + $0x390] sm:$0xff]  ;;  %v132_v57 = vld [vmem:[%s1231_s1 + $0x398] sm:$0xff]  ;;  %v732_v59 = vpack.c.bf16 %v114_v53, %v113_v51  ;;  %v702_v60 = vpack.c.bf16 %v100_v55, %v99_v54  ;;  %v101_v2 = vld [vmem:[%s1231_s1 + $0x2a0] sm:$0xff] }
  0x1b   :  { %689 = vmatpush3.bf16.msra.mxu1 %v688_v18  ;;  %330 = vmatprep.mubr.f32.mxu1 %v170_v43  ;;  %v83_v61 = vld [vmem:[%s1231_s1 + $0x210] sm:$0xff]  ;;  %v84_v62 = vld [vmem:[%s1231_s1 + $0x218] sm:$0xff]  ;;  %v734_v0 = vpack.c.bf16 %v132_v57, %v131_v56  ;;  %v102_v3 = vld [vmem:[%s1231_s1 + $0x2a8] sm:$0xff] }
  0x1c   :  { %691 = vmatprep.subr.bf16.mxu1 %v690_v23  ;;  %v115_v63 = vld [vmem:[%s1231_s1 + $0x310] sm:$0xff]  ;;  %v116_v1 = vld [vmem:[%s1231_s1 + $0x318] sm:$0xff]  ;;  %v133_v4 = vld [vmem:[%s1231_s1 + $0x3a0] sm:$0xff]  ;;  %v704_v6 = vpack.c.bf16 %v84_v62, %v83_v61  ;;  %v706_v8 = vpack.c.bf16 %v102_v3, %v101_v2 }
  0x1d   :  { %661 = vmatpush3.bf16.msra.mxu0 %v660_v31  ;;  %v134_v5 = vld [vmem:[%s1231_s1 + $0x3a8] sm:$0xff]  ;;  %v736_v7 = vpack.c.bf16 %v116_v1, %v115_v63  ;;  %v85_v9 = vld [vmem:[%s1231_s1 + $0x220] sm:$0xff]  ;;  %v103_v15 = vld [vmem:[%s1231_s1 + $0x2b0] sm:$0xff] }
  0x1e   :  { %663 = vmatprep.subr.bf16.mxu0 %v662_v35  ;;  %v86_v10 = vld [vmem:[%s1231_s1 + $0x228] sm:$0xff]  ;;  %v117_v11 = vld [vmem:[%s1231_s1 + $0x320] sm:$0xff]  ;;  %v738_v12 = vpack.c.bf16 %v134_v5, %v133_v4  ;;  %v104_v16 = vld [vmem:[%s1231_s1 + $0x2b8] sm:$0xff] }
  0x1f   :  { %693 = vmatpush3.bf16.msra.mxu1 %v692_v34  ;;  %v118_v14 = vld [vmem:[%s1231_s1 + $0x328] sm:$0xff]  ;;  %v135_v17 = vld [vmem:[%s1231_s1 + $0x3b0] sm:$0xff]  ;;  %v136_v18 = vld [vmem:[%s1231_s1 + $0x3b8] sm:$0xff]  ;;  %v708_v19 = vpack.c.bf16 %v86_v10, %v85_v9  ;;  %v710_v22 = vpack.c.bf16 %v104_v16, %v103_v15 }
  0x20   :  { %695 = vmatprep.subr.bf16.mxu1 %v694_v39  ;;  %v87_v20 = vld [vmem:[%s1231_s1 + $0x230] sm:$0xff]  ;;  %v740_v21 = vpack.c.bf16 %v118_v14, %v117_v11  ;;  %v88_v23 = vld [vmem:[%s1231_s1 + $0x238] sm:$0xff]  ;;  %v742_v26 = vpack.c.bf16 %v136_v18, %v135_v17  ;;  %v106_v28 = vld [vmem:[%s1231_s1 + $0x2c8] sm:$0xff] }
  0x21   :  { %665 = vmatpush3.bf16.msra.mxu0 %v664_v46  ;;  %v119_v24 = vld [vmem:[%s1231_s1 + $0x330] sm:$0xff]  ;;  %v120_v25 = vld [vmem:[%s1231_s1 + $0x338] sm:$0xff]  ;;  %v137_v29 = vld [vmem:[%s1231_s1 + $0x3c0] sm:$0xff] }
  0x22   :  { %699 = vmatprep.subr.bf16.mxu0 %v698_v48  ;;  %v138_v30 = vld [vmem:[%s1231_s1 + $0x3c8] sm:$0xff] }
  0x23   :  { %697 = vmatpush3.bf16.msra.mxu1 %v696_v47  ;;  %v16_v31 = vld [vmem:[%s1230_s0 + $0x8] sm:$0xff] }
  0x24   :  { %731 = vmatprep.subr.bf16.mxu1 %v730_v52  ;;  %261 = vmatmul.mubr.f32.vlgmr.msra.gmra.mrb[0].mxu0 %v161_v27  ;;  %v105_v27 = vld [vmem:[%s1231_s1 + $0x2c0] sm:$0xff] }
  0x25   :  { %701 = vmatpush3.bf16.msra.mxu0 %v700_v58 }
  0x26   :  { %331 = vmatmul.mubr.f32.vlgmr.msra.gmra.mrb[0].mxu1 %v168_v33  ;;  %703 = vmatprep.subr.bf16.mxu0 %v702_v60 }
  0x27   :  { %733 = vmatpush3.bf16.msra.mxu1 %v732_v59 }
  0x28   :  { %735 = vmatprep.subr.bf16.mxu1 %v734_v0 }
  0x29   :  { %705 = vmatpush3.bf16.msra.mxu0 %v704_v6 }
  0x2a   :  { %707 = vmatprep.subr.bf16.mxu0 %v706_v8 }
  0x2b   :  { %737 = vmatpush3.bf16.msra.mxu1 %v736_v7 }
  0x2c   :  { %739 = vmatprep.subr.bf16.mxu1 %v738_v12 }
  0x2d   :  { %8 = vsyncpa [#allocation3], 0  ;;  %709 = vmatpush3.bf16.msra.mxu0 %v708_v19  ;;  %v712_v32 = vpack.c.bf16 %v88_v23, %v87_v20  ;;  %v1125_v33 = vrot.slane %v16_v31, %v964_v13  ;;  %v171_v34 = vcombine.high %v16_v31, %v16_v31  ;;  %v744_v35 = vpack.c.bf16 %v120_v25, %v119_v24  ;;  %v89_v37 = vld [vmem:[%s1231_s1 + $0x240] sm:$0xff]  ;;  %v90_v38 = vld [vmem:[%s1231_s1 + $0x248] sm:$0xff] }
  0x2e   :  { %711 = vmatprep.subr.bf16.mxu0 %v710_v22  ;;  %v714_v36 = vpack.c.bf16 %v106_v28, %v105_v27  ;;  %v121_v39 = vld [vmem:[%s1231_s1 + $0x340] sm:$0xff]  ;;  %v746_v40 = vpack.c.bf16 %v138_v30, %v137_v29  ;;  %v122_v41 = vld [vmem:[%s1231_s1 + $0x348] sm:$0xff]  ;;  %v107_v42 = vld [vmem:[%s1231_s1 + $0x2d0] sm:$0xff]  ;;  %v716_v48 = vpack.c.bf16 %v90_v38, %v89_v37  ;;  %vm477_vm0 = vcmask 74752  }
  0x2f   :  { %741 = vmatpush3.bf16.msra.mxu1 %v740_v21  ;;  %v108_v43 = vld [vmem:[%s1231_s1 + $0x2d8] sm:$0xff]  ;;  %v186_v44 = vcombine.high %v1125_v33, %v1125_v33  ;;  %v185_v45 = vrot.slane %v171_v34, %v964_v13  ;;  %v139_v46 = vld [vmem:[%s1231_s1 + $0x3d0] sm:$0xff]  ;;  %v748_v50 = vpack.c.bf16 %v122_v41, %v121_v39  ;;  %v109_v56 = vld [vmem:[%s1231_s1 + $0x2e0] sm:$0xff] }
  0x30   :  { %743 = vmatprep.subr.bf16.mxu1 %v742_v26  ;;  %v140_v47 = vld [vmem:[%s1231_s1 + $0x3d8] sm:$0xff]  ;;  %v718_v51 = vpack.c.bf16 %v108_v43, %v107_v42  ;;  %v91_v13 = vld [vmem:[%s1231_s1 + $0x250] sm:$0xff]  ;;  %v110_v57 = vld [vmem:[%s1231_s1 + $0x2e8] sm:$0xff] }
  0x31   :  { %713 = vmatpush3.bf16.msra.mxu0 %v712_v32  ;;  %400 = vmatprep.mubr.f32.mxu0 %v186_v44  ;;  %v187_v49 = vcombine.high %v185_v45, %v185_v45  ;;  %v92_v52 = vld [vmem:[%s1231_s1 + $0x258] sm:$0xff]  ;;  %v123_v53 = vld [vmem:[%s1231_s1 + $0x350] sm:$0xff]  ;;  %v750_v54 = vpack.c.bf16 %v140_v47, %v139_v46  ;;  %v141_v58 = vld [vmem:[%s1231_s1 + $0x3e0] sm:$0xff]  ;;  %v722_v62 = vpack.c.bf16 %v110_v57, %v109_v56 }
  0x32   :  { %715 = vmatprep.subr.bf16.mxu0 %v714_v36  ;;  %v124_v55 = vld [vmem:[%s1231_s1 + $0x358] sm:$0xff]  ;;  %v142_v59 = vld [vmem:[%s1231_s1 + $0x3e8] sm:$0xff]  ;;  %v720_v60 = vpack.c.bf16 %v92_v52, %v91_v13  ;;  %v93_v63 = vld [vmem:[%s1231_s1 + $0x260] sm:$0xff] }
  0x33   :  { %745 = vmatpush3.bf16.msra.mxu1 %v744_v35  ;;  %470 = vmatprep.mubr.f32.mxu1 %v187_v49  ;;  %v752_v61 = vpack.c.bf16 %v124_v55, %v123_v53  ;;  %v94_v0 = vld [vmem:[%s1231_s1 + $0x268] sm:$0xff]  ;;  %v125_v1 = vld [vmem:[%s1231_s1 + $0x360] sm:$0xff]  ;;  %v754_v2 = vpack.c.bf16 %v142_v59, %v141_v58  ;;  %v111_v4 = vld [vmem:[%s1231_s1 + $0x2f0] sm:$0xff] }
  0x34   :  { %747 = vmatprep.subr.bf16.mxu1 %v746_v40  ;;  %v126_v3 = vld [vmem:[%s1231_s1 + $0x368] sm:$0xff]  ;;  %v112_v5 = vld [vmem:[%s1231_s1 + $0x2f8] sm:$0xff]  ;;  %v143_v6 = vld [vmem:[%s1231_s1 + $0x3f0] sm:$0xff]  ;;  %v724_v8 = vpack.c.bf16 %v94_v0, %v93_v63 }
  0x35   :  { %717 = vmatpush3.bf16.msra.mxu0 %v716_v48  ;;  %v144_v7 = vld [vmem:[%s1231_s1 + $0x3f8] sm:$0xff]  ;;  %v756_v9 = vpack.c.bf16 %v126_v3, %v125_v1  ;;  %v726_v10 = vpack.c.bf16 %v112_v5, %v111_v4  ;;  %v95_v11 = vld [vmem:[%s1231_s1 + $0x270] sm:$0xff]  ;;  %v493_v20 = vld [vmem:[%s1232_s2] ss:$0 sm:$0xff] }
  0x36   :  { %719 = vmatprep.subr.bf16.mxu0 %v718_v51  ;;  %v96_v12 = vld [vmem:[%s1231_s1 + $0x278] sm:$0xff]  ;;  %v758_v14 = vpack.c.bf16 %v144_v7, %v143_v6  ;;  %v127_v15 = vld [vmem:[%s1231_s1 + $0x370] sm:$0xff] }
  0x37   :  { %749 = vmatpush3.bf16.msra.mxu1 %v748_v50  ;;  %v128_v16 = vld [vmem:[%s1231_s1 + $0x378] sm:$0xff]  ;;  %v728_v17 = vpack.c.bf16 %v96_v12, %v95_v11  ;;  %s793_s1 = smov [#allocation2]  }
  0x38   :  { %751 = vmatprep.subr.bf16.mxu1 %v750_v54  ;;  %v760_v18 = vpack.c.bf16 %v128_v16, %v127_v15  ;;  %s485_s29 = sshll.u32 %s793_s1, 4  ;;  %s486_s29 = int_to_ptr.vmem [resolvable:$true] %s485_s29 }
  0x39   :  { %721 = vmatpush3.bf16.msra.mxu0 %v720_v60  ;;  %s768_s2 = scalar_lea.vmem %s486_s29, 32  ;;  %p773_p1 = scmp.lt.s32.totalorder %s486_s29, %s486_s29 }
  0x3a   :  { %723 = vmatprep.subr.bf16.mxu0 %v722_v62  ;;  %p769_p0 = scmp.ne.s32.totalorder %s486_s29, %s768_s2  ;;  %p774_p2 = scmp.lt.s32.totalorder %s768_s2, %s768_s2 }
  0x3b   :  { %753 = vmatpush3.bf16.msra.mxu1 %v752_v61 }
  0x3c   :  { %755 = vmatprep.subr.bf16.mxu1 %v754_v2  ;;  %p775_p3 = por %p774_p2, %p773_p1 }
  0x3d   :  { %725 = vmatpush3.bf16.msra.mxu0 %v724_v8 }
  0x3e   :  { %727 = vmatprep.subr.bf16.mxu0 %v726_v10  ;;  %p776_p4 = pnand %p775_p3, %p769_p0 }
  0x3f   :  { %757 = vmatpush3.bf16.msra.mxu1 %v756_v9 }
  0x40   :  { %759 = vmatprep.subr.bf16.mxu1 %v758_v14 }
  0x41   :  { %729 = vmatpush3.bf16.msra.mxu0 %v728_v17 }
  0x43   :  { %761 = vmatpush3.bf16.msra.mxu1 %v760_v18 }
  0x44   :  { %401 = vmatmul.mubr.f32.vlgmr.msra.gmra.mrb[2].mxu0 %v1125_v33 }
  0x46   :  { %471 = vmatmul.mubr.f32.vlgmr.msra.gmra.mrb[2].mxu1 %v185_v45 }
  0xf7   :  { %v526_v19 = vpop.f32.mrb[0].mxu0 }
  0xf8   :  { %v527_v21 = vpop.f32.mrb[1].mxu0 }
  0xf9   :  { %v561_v22 = vpop.f32.mrb[0].mxu1  ;;  %v528_v23 = vadd.f32 %v527_v21, %v526_v19 }
  0xfa   :  { %v562_v24 = vpop.f32.mrb[1].mxu1 }
  0xfb   :  { %v563_v25 = vadd.f32 %v562_v24, %v561_v22  ;;  %v263_v26 = vadd.f32 %v528_v23, %v493_v20 }
  0xfd   :  { %v333_v27 = vadd.f32 %v563_v25, %v263_v26 }
 0x117   :  { %v596_v28 = vpop.f32.mrb[2].mxu0 }
 0x118   :  { %v597_v29 = vpop.f32.mrb[3].mxu0 }
 0x119   :  { %v631_v30 = vpop.f32.mrb[2].mxu1  ;;  %v598_v31 = vadd.f32 %v597_v29, %v596_v28 }
 0x11a   :  { %v632_v32 = vpop.f32.mrb[3].mxu1 }
 0x11b   :  { %v633_v34 = vadd.f32 %v632_v32, %v631_v30  ;;  %v403_v33 = vadd.f32 %v598_v31, %v333_v27 }
 0x11d   :  { %v473_v35 = vadd.f32 %v633_v34, %v403_v33 }
 0x11f   :  { %766 = vtanh.f32 %v473_v35 }
 0x129   :  { %v767_v36 = vpop.eup %766 }
 0x12a   :  { %478 = vst.msk [vmem:[#allocation2] sm:$0x3] %vm477_vm0, %v767_v36 }
 0x12b   :  { %779 = shalt.err (!%p776_p4)
}
 0x12c   :  { %s780_s4 = scalar_lea.hbm %s1233_s3, 32 }
 0x12d   :  { %p781_p5 = scmp.ne.s32.totalorder %s1233_s3, %s780_s4  ;;  %p784_p6 = scmp.lt.u32.totalorder %s780_s4, %s1233_s3 }
 0x12f   :  { %p786_p7 = pnand %p784_p6, %p781_p5 }
 0x131   :  { %789 = shalt.err (!%p786_p7)
}
 0x132   :  { %488 = dma.vmem_to_hbm [thread:$0]  %s486_s29, 32, %s1233_s3, [#allocation3]  }
 0x133   :  { %790 = dma.done.wait [#allocation3], 32  }
 0x134   :  { %791 = vsyncadd [#allocation3], 4294967264 }
 0x135   :  { %492 = vsyncpa [#allocation3], 1 }

</bundles_post_ra>
